<compile_context>
chip_gen: v5e
topology: v5e:2x2
jax: 0.10.0
libtpu: 0.0.40
codegen_flags: <defaults>
</compile_context>

<pallas_src>
import functools

import numpy as np

import jax
import jax.numpy as jnp
from jax.experimental import pallas as pl
from jax.experimental.pallas import tpu as pltpu


def _disc_kernel(x_ref, w1_ref, b1_ref, w2_ref, b2_ref, w3_ref, b3_ref,
                 pool_ref, out_ref, *, W, D):
    # x_ref    : (B*F, D)    VMEM  input, (batch, frame) flattened row-major
    # w1_ref   : (W*D, H1)   VMEM  conv1 weight, im2col layout (k major, d minor)
    # b1_ref   : (1, H1)     VMEM
    # w2_ref   : (H1, H2)    VMEM  conv2 1x1 weight (transposed)
    # b2_ref   : (1, H2)     VMEM
    # w3_ref   : (H2, 1)     VMEM  conv3 1x1 weight as a column
    # b3_ref   : (1,)        SMEM  conv3 bias (scalar)
    # pool_ref : (B, B*F)    VMEM  trace-time mean-pooling matrix (entries 1/L)
    # out_ref  : (B, 1)      VMEM
    BF = x_ref.shape[0]

    # ---- im2col in registers: xcol[r, k*D:(k+1)*D] = x[(r + k) mod BF] -----
    # The wrapped rows (r + k >= BF) and the partial-window rows (t >= L) are
    # junk but finite; the pooling matrix zeroes their contribution exactly.
    x = x_ref[...]                                        # (B*F, D)
    cols = [x]
    for k in range(1, W):                                 # W static -> unrolled
        cols.append(jnp.concatenate([x[k:, :], x[:k, :]], axis=0))
    xcol = jnp.concatenate(cols, axis=1)                  # (B*F, W*D), stays in vregs

    # ---- Conv1d(d_in -> H1, kernel=W, valid) as ONE K=W*D matmul + ReLU ----
    h1 = jnp.dot(xcol, w1_ref[...], preferred_element_type=jnp.float32) + b1_ref[...]
    h1 = jnp.maximum(h1, 0.0)                             # (B*F, H1)

    # ---- Conv1d(H1 -> H2, kernel=1) + ReLU ---------------------------------
    h2 = jnp.dot(h1, w2_ref[...], preferred_element_type=jnp.float32) + b2_ref[...]
    h2 = jnp.maximum(h2, 0.0)                             # (B*F, H2)

    # ---- Mean over the L valid steps, then conv3 (1x1, 1 channel) ----------
    # pool[b, r] = 1/L iff row r belongs to batch b with time index < L, so
    # pooled = pool @ h2 is the per-batch temporal mean of h2, and the conv3
    # projection is a tiny (B, H2) @ (H2, 1) dot.
    pooled = jnp.dot(pool_ref[...], h2, preferred_element_type=jnp.float32)   # (B, H2)
    out_ref[...] = (jnp.dot(pooled, w3_ref[...], preferred_element_type=jnp.float32)
                    + b3_ref[0])                          # (B, 1)


def rmi_motion_discriminator(state, params, window_len):
    """state: (B, F, D) float32 -> (B, 1) float32 discriminator scores."""
    w1, b1, w2, b2, w3, b3 = params
    B, F, D = state.shape
    W = window_len
    assert F >= W, f"frame count {F} must be >= window_len {W}"
    L = F - W + 1
    WD, H1 = w1.shape
    H2 = w2.shape[1]
    assert WD == W * D, (WD, W, D)
    assert w3.shape == (H2, 1), w3.shape

    x2 = state.reshape(B * F, D)          # contiguous -> free metadata reshape

    # Trace-time constant pooling matrix (mean over valid conv outputs folded
    # in as 1/L).  Built with numpy so no VPU work happens per invocation.
    rows = np.arange(B, dtype=np.int64).reshape(B, 1)
    cols = np.arange(B * F, dtype=np.int64).reshape(1, B * F)
    valid = np.logical_and(cols // F == rows, cols % F < L)
    pool = jnp.asarray(np.where(valid, 1.0 / L, 0.0).astype(np.float32))  # (B, B*F)

    kernel = functools.partial(_disc_kernel, W=W, D=D)

    flops = (2 * B * F * (WD * H1 + H1 * H2)   # conv1 + conv2 matmuls
             + 2 * B * (B * F) * H2            # pooling matmul
             + 2 * B * H2)                     # conv3 projection
    bytes_accessed = 4 * (x2.size + w1.size + b1.size + w2.size + b2.size
                          + w3.size + b3.size + pool.size + B)

    return pl.pallas_call(
        kernel,
        out_shape=jax.ShapeDtypeStruct((B, 1), jnp.float32),
        in_specs=[
            pl.BlockSpec(memory_space=pltpu.MemorySpace.VMEM),  # x
            pl.BlockSpec(memory_space=pltpu.MemorySpace.VMEM),  # w1 (im2col layout)
            pl.BlockSpec(memory_space=pltpu.MemorySpace.VMEM),  # b1
            pl.BlockSpec(memory_space=pltpu.MemorySpace.VMEM),  # w2
            pl.BlockSpec(memory_space=pltpu.MemorySpace.VMEM),  # b2
            pl.BlockSpec(memory_space=pltpu.MemorySpace.VMEM),  # w3 (column)
            pl.BlockSpec(memory_space=pltpu.MemorySpace.SMEM),  # b3
            pl.BlockSpec(memory_space=pltpu.MemorySpace.VMEM),  # pool
        ],
        out_specs=pl.BlockSpec(memory_space=pltpu.MemorySpace.VMEM),
        cost_estimate=pl.CostEstimate(flops=flops, transcendentals=0,
                                      bytes_accessed=bytes_accessed),
    )(x2, w1, b1, w2, b2, w3, b3, pool)


def _reference(state, c1_w, c1_b, c2_w, c2_b, c3_w, c3_b):
    """Pure-JAX reference mirroring the PyTorch module (NCW conv stack)."""
    x = jnp.transpose(state, (0, 2, 1))  # (B, D, F)  == state.transpose(1, 2)
    dn = ('NCH', 'OIH', 'NCH')
    y = jax.lax.conv_general_dilated(x, c1_w, (1,), 'VALID', dimension_numbers=dn)
    y = jax.nn.relu(y + c1_b[None, :, None])
    y = jax.lax.conv_general_dilated(y, c2_w, (1,), 'VALID', dimension_numbers=dn)
    y = jax.nn.relu(y + c2_b[None, :, None])
    y = jax.lax.conv_general_dilated(y, c3_w, (1,), 'VALID', dimension_numbers=dn)
    y = y + c3_b[None, :, None]
    return jnp.mean(y, axis=-1)  # (B, 1)


if __name__ == "__main__":
    config = {"d_in": 16, "d_hidden1": 32, "d_hidden2": 32, "window_len": 8}
    B, F = 2, 16
    D, H1, H2, W = (config["d_in"], config["d_hidden1"],
                    config["d_hidden2"], config["window_len"])

    key = jax.random.PRNGKey(0)
    ks = jax.random.split(key, 7)

    # Deterministic synthetic parameters with the PyTorch Conv1d shapes.
    state = jax.random.normal(ks[0], (B, F, D), jnp.float32)
    conv1_w = jax.random.normal(ks[1], (H1, D, W), jnp.float32) * 0.1
    conv1_b = jax.random.normal(ks[2], (H1,), jnp.float32) * 0.1
    conv2_w = jax.random.normal(ks[3], (H2, H1, 1), jnp.float32) * 0.1
    conv2_b = jax.random.normal(ks[4], (H2,), jnp.float32) * 0.1
    conv3_w = jax.random.normal(ks[5], (1, H2, 1), jnp.float32) * 0.1
    conv3_b = jax.random.normal(ks[6], (1,), jnp.float32) * 0.1

    # One-time repack of PyTorch-shaped weights into kernel-friendly layouts.
    w1 = jnp.transpose(conv1_w, (2, 1, 0)).reshape(W * D, H1)  # (W*D, H1), k-major
    b1 = conv1_b.reshape(1, H1)
    w2 = jnp.transpose(conv2_w[:, :, 0])                       # (H1, H2)
    b2 = conv2_b.reshape(1, H2)
    w3 = conv3_w[0, :, 0].reshape(H2, 1)                       # (H2, 1) column
    b3 = conv3_b.reshape(1)                                    # scalar in SMEM
    params = (w1, b1, w2, b2, w3, b3)

    out = rmi_motion_discriminator(state, params, W)
    out = jax.block_until_ready(out)

    ref = _reference(state, conv1_w, conv1_b, conv2_w, conv2_b, conv3_w, conv3_b)
    assert out.shape == (B, 1), out.shape
    assert jnp.allclose(out, ref, atol=1e-4, rtol=1e-4), (out, ref)

    print("KERNEL_OK")
</pallas_src>

<mosaic_0001>
module attributes {stable_mosaic.version = 11 : i64} {
  func.func @_disc_kernel(%arg0: memref<32x16xf32, #tpu.memory_space<vmem>>, %arg1: memref<128x32xf32, #tpu.memory_space<vmem>>, %arg2: memref<1x32xf32, #tpu.memory_space<vmem>>, %arg3: memref<32x32xf32, #tpu.memory_space<vmem>>, %arg4: memref<1x32xf32, #tpu.memory_space<vmem>>, %arg5: memref<32x1xf32, #tpu.memory_space<vmem>>, %arg6: memref<1xf32, #tpu.memory_space<smem>>, %arg7: memref<2x32xf32, #tpu.memory_space<vmem>>, %arg8: memref<2x1xf32, #tpu.memory_space<vmem>>) attributes {dimension_semantics = [], scalar_prefetch = 0 : i64, scratch_operands = 0 : i64, tpu.core_type = #tpu.core_type<tc>} {
    %c0 = arith.constant 0 : index
    %c0_0 = arith.constant 0 : index
    %0 = vector.load %arg0[%c0, %c0_0] : memref<32x16xf32, #tpu.memory_space<vmem>>, vector<32x16xf32>
    %1 = vector.extract_strided_slice %0 {offsets = [1, 0], sizes = [31, 16], strides = [1, 1]} : vector<32x16xf32> to vector<31x16xf32>
    %2 = vector.extract_strided_slice %0 {offsets = [0, 0], sizes = [1, 16], strides = [1, 1]} : vector<32x16xf32> to vector<1x16xf32>
    %3 = tpu.concatenate %1, %2 in 0 : vector<31x16xf32>, vector<1x16xf32> -> vector<32x16xf32>
    %4 = vector.extract_strided_slice %0 {offsets = [2, 0], sizes = [30, 16], strides = [1, 1]} : vector<32x16xf32> to vector<30x16xf32>
    %5 = vector.extract_strided_slice %0 {offsets = [0, 0], sizes = [2, 16], strides = [1, 1]} : vector<32x16xf32> to vector<2x16xf32>
    %6 = tpu.concatenate %4, %5 in 0 : vector<30x16xf32>, vector<2x16xf32> -> vector<32x16xf32>
    %7 = vector.extract_strided_slice %0 {offsets = [3, 0], sizes = [29, 16], strides = [1, 1]} : vector<32x16xf32> to vector<29x16xf32>
    %8 = vector.extract_strided_slice %0 {offsets = [0, 0], sizes = [3, 16], strides = [1, 1]} : vector<32x16xf32> to vector<3x16xf32>
    %9 = tpu.concatenate %7, %8 in 0 : vector<29x16xf32>, vector<3x16xf32> -> vector<32x16xf32>
    %10 = vector.extract_strided_slice %0 {offsets = [4, 0], sizes = [28, 16], strides = [1, 1]} : vector<32x16xf32> to vector<28x16xf32>
    %11 = vector.extract_strided_slice %0 {offsets = [0, 0], sizes = [4, 16], strides = [1, 1]} : vector<32x16xf32> to vector<4x16xf32>
    %12 = tpu.concatenate %10, %11 in 0 : vector<28x16xf32>, vector<4x16xf32> -> vector<32x16xf32>
    %13 = vector.extract_strided_slice %0 {offsets = [5, 0], sizes = [27, 16], strides = [1, 1]} : vector<32x16xf32> to vector<27x16xf32>
    %14 = vector.extract_strided_slice %0 {offsets = [0, 0], sizes = [5, 16], strides = [1, 1]} : vector<32x16xf32> to vector<5x16xf32>
    %15 = tpu.concatenate %13, %14 in 0 : vector<27x16xf32>, vector<5x16xf32> -> vector<32x16xf32>
    %16 = vector.extract_strided_slice %0 {offsets = [6, 0], sizes = [26, 16], strides = [1, 1]} : vector<32x16xf32> to vector<26x16xf32>
    %17 = vector.extract_strided_slice %0 {offsets = [0, 0], sizes = [6, 16], strides = [1, 1]} : vector<32x16xf32> to vector<6x16xf32>
    %18 = tpu.concatenate %16, %17 in 0 : vector<26x16xf32>, vector<6x16xf32> -> vector<32x16xf32>
    %19 = vector.extract_strided_slice %0 {offsets = [7, 0], sizes = [25, 16], strides = [1, 1]} : vector<32x16xf32> to vector<25x16xf32>
    %20 = vector.extract_strided_slice %0 {offsets = [0, 0], sizes = [7, 16], strides = [1, 1]} : vector<32x16xf32> to vector<7x16xf32>
    %21 = tpu.concatenate %19, %20 in 0 : vector<25x16xf32>, vector<7x16xf32> -> vector<32x16xf32>
    %22 = tpu.concatenate %0, %3, %6, %9, %12, %15, %18, %21 in 1 : vector<32x16xf32>, vector<32x16xf32>, vector<32x16xf32>, vector<32x16xf32>, vector<32x16xf32>, vector<32x16xf32>, vector<32x16xf32>, vector<32x16xf32> -> vector<32x128xf32>
    %c0_1 = arith.constant 0 : index
    %c0_2 = arith.constant 0 : index
    %23 = vector.load %arg1[%c0_1, %c0_2] : memref<128x32xf32, #tpu.memory_space<vmem>>, vector<128x32xf32>
    %cst = arith.constant dense<0.000000e+00> : vector<32x32xf32>
    %24 = tpu.matmul %22, %23, %cst {dimension_numbers = #tpu.dot_dimension_numbers<[1], [0], [0], [1], [0, 0, 1, 1], [], []>} : vector<32x128xf32>, vector<128x32xf32>, vector<32x32xf32> -> vector<32x32xf32>
    %c0_3 = arith.constant 0 : index
    %c0_4 = arith.constant 0 : index
    %25 = vector.load %arg2[%c0_3, %c0_4] : memref<1x32xf32, #tpu.memory_space<vmem>>, vector<1x32xf32>
    %26 = vector.broadcast %25 : vector<1x32xf32> to vector<32x32xf32>
    %27 = arith.addf %24, %26 : vector<32x32xf32>
    %cst_5 = arith.constant 0.000000e+00 : f32
    %28 = vector.broadcast %cst_5 : f32 to vector<32x32xf32>
    %29 = arith.maximumf %27, %28 : vector<32x32xf32>
    %c0_6 = arith.constant 0 : index
    %c0_7 = arith.constant 0 : index
    %30 = vector.load %arg3[%c0_6, %c0_7] : memref<32x32xf32, #tpu.memory_space<vmem>>, vector<32x32xf32>
    %cst_8 = arith.constant dense<0.000000e+00> : vector<32x32xf32>
    %31 = tpu.matmul %29, %30, %cst_8 {dimension_numbers = #tpu.dot_dimension_numbers<[1], [0], [0], [1], [0, 0, 1, 1], [], []>} : vector<32x32xf32>, vector<32x32xf32>, vector<32x32xf32> -> vector<32x32xf32>
    %c0_9 = arith.constant 0 : index
    %c0_10 = arith.constant 0 : index
    %32 = vector.load %arg4[%c0_9, %c0_10] : memref<1x32xf32, #tpu.memory_space<vmem>>, vector<1x32xf32>
    %33 = vector.broadcast %32 : vector<1x32xf32> to vector<32x32xf32>
    %34 = arith.addf %31, %33 : vector<32x32xf32>
    %cst_11 = arith.constant 0.000000e+00 : f32
    %35 = vector.broadcast %cst_11 : f32 to vector<32x32xf32>
    %36 = arith.maximumf %34, %35 : vector<32x32xf32>
    %c0_12 = arith.constant 0 : index
    %c0_13 = arith.constant 0 : index
    %37 = vector.load %arg7[%c0_12, %c0_13] : memref<2x32xf32, #tpu.memory_space<vmem>>, vector<2x32xf32>
    %cst_14 = arith.constant dense<0.000000e+00> : vector<2x32xf32>
    %38 = tpu.matmul %37, %36, %cst_14 {dimension_numbers = #tpu.dot_dimension_numbers<[1], [0], [0], [1], [0, 0, 1, 1], [], []>} : vector<2x32xf32>, vector<32x32xf32>, vector<2x32xf32> -> vector<2x32xf32>
    %c0_15 = arith.constant 0 : index
    %c0_16 = arith.constant 0 : index
    %39 = vector.load %arg5[%c0_15, %c0_16] : memref<32x1xf32, #tpu.memory_space<vmem>>, vector<32x1xf32>
    %cst_17 = arith.constant dense<0.000000e+00> : vector<2x1xf32>
    %40 = tpu.matmul %38, %39, %cst_17 {dimension_numbers = #tpu.dot_dimension_numbers<[1], [0], [0], [1], [0, 0, 1, 1], [], []>} : vector<2x32xf32>, vector<32x1xf32>, vector<2x1xf32> -> vector<2x1xf32>
    %c0_18 = arith.constant 0 : index
    %41 = memref.load %arg6[%c0_18] : memref<1xf32, #tpu.memory_space<smem>>
    %42 = vector.broadcast %41 : f32 to vector<2x1xf32>
    %43 = arith.addf %40, %42 : vector<2x1xf32>
    %c0_19 = arith.constant 0 : index
    %c0_20 = arith.constant 0 : index
    %44 = vector.load %arg8[%c0_19, %c0_20] : memref<2x1xf32, #tpu.memory_space<vmem>>, vector<2x1xf32>
    tpu.vector_store %arg8[%c0_19, %c0_20], %43 {strides = array<i32>} : memref<2x1xf32, #tpu.memory_space<vmem>>, vector<2x1xf32>,
    return
  }
}

</mosaic_0001>

<bundles_post_ra>
// kernel: tpu_custom_call.1
= control target key start
LH: loop header
LB: loop body
LE: loop exit
PB: predicated region body
PF: predicated region fallthrough
CT: control target
= control target key end

     0   :  { %vm38_vm0 = vcmask 1046528   ;;  %vm60_vm1 = vcmask 1044480   ;;  %vm49_vm2 = vcmask 1045504   ;;  %vm71_vm3 = vcmask 1043456   ;;  %s476_s11 = smov 16   ;;  %s477_s12 = smov 48   ;;  %s775_s0 = inlined_call_operand.vmem [shape: f32[32,16], index: 0, kind: input, shape index: {}]   ;;  %s776_s1 = inlined_call_operand.vmem [shape: f32[128,32], index: 1, kind: input, shape index: {}]   ;;  %s777_s2 = inlined_call_operand.vmem [shape: f32[1,32], index: 2, kind: input, shape index: {}]   ;;  %s778_s3 = inlined_call_operand.vmem [shape: f32[32,32], index: 3, kind: input, shape index: {}]   ;;  %s779_s4 = inlined_call_operand.vmem [shape: f32[1,32], index: 4, kind: input, shape index: {}]   ;;  %s780_s5 = inlined_call_operand.vmem [shape: f32[32,1], index: 5, kind: input, shape index: {}]   ;;  %s781_s7 = inlined_call_operand.vmem [shape: f32[2,32], index: 7, kind: input, shape index: {}]   ;;  %s782_s6 = inlined_call_operand.<no memory space> [shape: f32[1], index: 6, kind: input, shape index: {}]   ;;  %s783_s8 = inlined_call_operand.vmem [shape: f32[2,1], index: 8, kind: output, shape index: {}]  }
   0x1   :  { %v531_v0 = vld [vmem:[%s775_s0] sm:$0xff]  ;;  %v536_v1 = vld [vmem:[%s775_s0 + $0x8] sm:$0xff]  ;;  %v541_v2 = vld [vmem:[%s775_s0 + $0x10] sm:$0xff]  ;;  %vm82_vm4 = vcmask 1042432   ;;  %vm104_vm5 = vcmask 1040384   ;;  %vm93_vm6 = vcmask 1041408  }
   0x2   :  { %v39_v3 = vrot.slane %v531_v0, 1  ;;  %v40_v4 = vrot.slane %v536_v1, 1  ;;  %v42_v5 = vrot.slane %v541_v2, 1  ;;  %v61_v6 = vrot.slane %v531_v0, 3  ;;  %v581_v26 = vld [vmem:[%s775_s0 + $0x18] sm:$0xff]  ;;  %s478_s0 = smov 32  }
   0x3   :  { %v62_v7 = vrot.slane %v536_v1, 3  ;;  %v64_v8 = vrot.slane %v541_v2, 3  ;;  %v50_v9 = vrot.slane %v531_v0, 2  ;;  %v51_v12 = vrot.slane %v536_v1, 2  ;;  %s479_s15 = smov 64   ;;  %s480_s16 = smov 80  }
   0x4   :  { %v41_v10 = vsel %vm38_vm0, %v39_v3, %v40_v4  ;;  %v43_v11 = vsel %vm38_vm0, %v40_v4, %v42_v5  ;;  %v53_v13 = vrot.slane %v541_v2, 2  ;;  %v72_v17 = vrot.slane %v531_v0, 4  ;;  %v256_v43 = vld [vmem:[%s776_s1 + $0x78] sm:$0xff]  ;;  %v255_v44 = vld [vmem:[%s776_s1 + $0x70] sm:$0xff]  ;;  %v254_v49 = vld [vmem:[%s776_s1 + $0x68] sm:$0xff]  ;;  %s481_s25 = smov 112  }
   0x5   :  { %v419_v14 = vpack.i.bf16 %v43_v11, %v41_v10  ;;  %v63_v15 = vsel %vm60_vm1, %v61_v6, %v62_v7  ;;  %v65_v16 = vsel %vm60_vm1, %v62_v7, %v64_v8  ;;  %v73_v19 = vrot.slane %v536_v1, 4  ;;  %261 = vmatpush.msra.mxu0 %v256_v43  ;;  %v253_v54 = vld [vmem:[%s776_s1 + $0x60] sm:$0xff]  ;;  %s482_s26 = smov 96  }
   0x6   :  { %v429_v18 = vpack.i.bf16 %v65_v16, %v63_v15  ;;  %v75_v20 = vrot.slane %v541_v2, 4  ;;  %v52_v21 = vsel %vm49_vm2, %v50_v9, %v51_v12  ;;  %v54_v22 = vsel %vm49_vm2, %v51_v12, %v53_v13  ;;  %v251_v15 = vld [vmem:[%s776_s1 + $0x50] sm:$0xff]  ;;  %v250_v16 = vld [vmem:[%s776_s1 + $0x48] sm:$0xff] }
   0x7   :  { %420 = vrot.lane.b32.xlu0 %v419_v14, %s476_s11  ;;  %v74_v23 = vsel %vm71_vm3, %v72_v17, %v73_v19  ;;  %v83_v25 = vrot.slane %v531_v0, 5  ;;  %v84_v27 = vrot.slane %v536_v1, 5  ;;  %v424_v28 = vpack.i.bf16 %v54_v22, %v52_v21  ;;  %262 = vmatpush.msra.mxu0 %v255_v44  ;;  %v252_v14 = vld [vmem:[%s776_s1 + $0x58] sm:$0xff]  ;;  %v245_v21 = vld [vmem:[%s776_s1 + $0x20] sm:$0xff] }
   0x8   :  { %430 = vrot.lane.b32.xlu1 %v429_v18, %s477_s12  ;;  %v76_v24 = vsel %vm71_vm3, %v73_v19, %v75_v20  ;;  %v105_v29 = vrot.slane %v531_v0, 7  ;;  %v86_v30 = vrot.slane %v541_v2, 5  ;;  %v106_v32 = vrot.slane %v536_v1, 7  ;;  %v248_v18 = vld [vmem:[%s776_s1 + $0x38] sm:$0xff]  ;;  %v247_v19 = vld [vmem:[%s776_s1 + $0x30] sm:$0xff] }
   0x9   :  { %v434_v31 = vpack.i.bf16 %v76_v24, %v74_v23  ;;  %v108_v33 = vrot.slane %v541_v2, 7  ;;  %v85_v34 = vsel %vm82_vm4, %v83_v25, %v84_v27  ;;  %v44_v35 = vrot.slane %v581_v26, 1  ;;  %263 = vmatpush.msra.mxu0 %v254_v49  ;;  %v244_v22 = vld [vmem:[%s776_s1 + $0x18] sm:$0xff]  ;;  %v243_v23 = vld [vmem:[%s776_s1 + $0x10] sm:$0xff]  ;;  %v242_v24 = vld [vmem:[%s776_s1 + $0x8] sm:$0xff] }
   0xa   :  { %v87_v36 = vsel %vm82_vm4, %v84_v27, %v86_v30  ;;  %v94_v37 = vrot.slane %v531_v0, 6  ;;  %v95_v38 = vrot.slane %v536_v1, 6  ;;  %v97_v40 = vrot.slane %v541_v2, 6 }
   0xb   :  { %v439_v39 = vpack.i.bf16 %v87_v36, %v85_v34  ;;  %v107_v41 = vsel %vm104_vm5, %v105_v29, %v106_v32  ;;  %v109_v42 = vsel %vm104_vm5, %v106_v32, %v108_v33  ;;  %v45_v45 = vsel %vm38_vm0, %v42_v5, %v44_v35  ;;  %264 = vmatpush.msra.mxu0 %v253_v54 }
   0xc   :  { %v48_v46 = vsel %vm38_vm0, %v44_v35, %v39_v3  ;;  %v96_v47 = vsel %vm93_vm6, %v94_v37, %v95_v38  ;;  %v98_v48 = vsel %vm93_vm6, %v95_v38, %v97_v40  ;;  %v449_v50 = vpack.i.bf16 %v109_v42, %v107_v41  ;;  %v297_v42 = vld [vmem:[%s778_s3 + $0x18] sm:$0xff] }
   0xd   :  { %440 = vrot.lane.b32.xlu2 %v439_v39, %s480_s16  ;;  %v454_v51 = vpack.i.bf16 %v48_v46, %v45_v45  ;;  %v66_v52 = vrot.slane %v581_v26, 3  ;;  %v444_v53 = vpack.i.bf16 %v98_v48, %v96_v47  ;;  %v77_v55 = vrot.slane %v581_v26, 4  ;;  %265 = vmatpush.msra.mxu0 %v252_v14 }
   0xe   :  { %v55_v56 = vrot.slane %v581_v26, 2  ;;  %v99_v5 = vrot.slane %v581_v26, 6  ;;  %v88_v7 = vrot.slane %v581_v26, 5  ;;  %vm206_vm7 = vcmask 130048   ;;  %326 = vmatpush.msra.mxu1 %v297_v42 }
   0xf   :  { %425 = vrot.lane.b32.xlu0 %v424_v28, %s478_s0  ;;  %v67_v57 = vsel %vm60_vm1, %v64_v8, %v66_v52  ;;  %v70_v58 = vsel %vm60_vm1, %v66_v52, %v61_v6  ;;  %v78_v59 = vsel %vm71_vm3, %v75_v20, %v77_v55  ;;  %v81_v60 = vsel %vm71_vm3, %v77_v55, %v72_v17  ;;  %v249_v17 = vld [vmem:[%s776_s1 + $0x40] sm:$0xff]  ;;  %v246_v20 = vld [vmem:[%s776_s1 + $0x28] sm:$0xff] }
  0x10   :  { %435 = vrot.lane.b32.xlu1 %v434_v31, %s479_s15  ;;  %v56_v61 = vsel %vm49_vm2, %v53_v13, %v55_v56  ;;  %v59_v62 = vsel %vm49_vm2, %v55_v56, %v50_v9  ;;  %v464_v63 = vpack.i.bf16 %v70_v58, %v67_v57  ;;  %v469_v3 = vpack.i.bf16 %v81_v60, %v78_v59 }
  0x11   :  { %v459_v4 = vpack.i.bf16 %v59_v62, %v56_v61  ;;  %v110_v6 = vrot.slane %v581_v26, 7  ;;  %v100_v8 = vsel %vm93_vm6, %v97_v40, %v99_v5  ;;  %v89_v9 = vsel %vm82_vm4, %v86_v30, %v88_v7  ;;  %266 = vmatpush.msra.mxu0 %v251_v15 }
  0x12   :  { %v103_v11 = vsel %vm93_vm6, %v99_v5, %v94_v37  ;;  %v92_v13 = vsel %vm82_vm4, %v88_v7, %v83_v25  ;;  %v241_v25 = vld [vmem:[%s776_s1] sm:$0xff]  ;;  %vm211_vm8 = vcmask 261120   ;;  %vm216_vm9 = vcmask 392192  }
  0x13   :  { %v111_v10 = vsel %vm104_vm5, %v108_v33, %v110_v6  ;;  %v114_v12 = vsel %vm104_vm5, %v110_v6, %v105_v29  ;;  %267 = vmatpush.msra.mxu0 %v250_v16  ;;  %vm221_vm10 = vcmask 523264   ;;  %vm226_vm11 = vcmask 654336  }
  0x14   :  { %vm231_vm12 = vcmask 785408   ;;  %vm236_vm13 = vcmask 916480   ;;  %vm400_vm14 = vcmask 1024  }
  0x15   :  { %445 = vrot.lane.b32.xlu2 %v444_v53, %s482_s26  ;;  %268 = vmatpush.msra.mxu0 %v249_v17 }
  0x17   :  { %450 = vrot.lane.b32.xlu0 %v449_v50, %s481_s25  ;;  %269 = vmatpush.msra.mxu0 %v248_v18 }
  0x18   :  { %455 = vrot.lane.b32.xlu1 %v454_v51, %s476_s11 }
  0x19   :  { %270 = vmatpush.msra.mxu0 %v247_v19 }
  0x1b   :  { %271 = vmatpush.msra.mxu0 %v246_v20 }
  0x1d   :  { %460 = vrot.lane.b32.xlu2 %v459_v4, %s478_s0  ;;  %272 = vmatpush.msra.mxu0 %v245_v21 }
  0x1f   :  { %465 = vrot.lane.b32.xlu0 %v464_v63, %s477_s12  ;;  %273 = vmatpush.msra.mxu0 %v244_v22 }
  0x20   :  { %470 = vrot.lane.b32.xlu1 %v469_v3, %s479_s15 }
  0x21   :  { %274 = vmatpush.msra.mxu0 %v243_v23 }
  0x23   :  { %275 = vmatpush.msra.mxu0 %v242_v24 }
  0x25   :  { %172 = vrot.lane.b32.xlu2 %v89_v9, %s480_s16  ;;  %276 = vmatpush.msra.mxu0 %v241_v25 }
  0x27   :  { %185 = vrot.lane.b32.xlu0 %v100_v8, %s482_s26 }
  0x28   :  { %198 = vrot.lane.b32.xlu1 %v111_v10, %s481_s25 }
  0x2d   :  { %174 = vrot.lane.b32.xlu2 %v92_v13, %s480_s16 }
  0x2f   :  { %187 = vrot.lane.b32.xlu0 %v103_v11, %s482_s26 }
  0x30   :  { %200 = vrot.lane.b32.xlu1 %v114_v12, %s481_s25 }
  0x67   :  { %v441_v27 = vpop.permute.xlu2 %440 }
  0x68   :  { %v442_v43 = vunpack.i.l.bf16 %v441_v27  ;;  %v443_v58 = vunpack.i.h.bf16 %v441_v27 }
  0x6f   :  { %v446_v31 = vpop.permute.xlu2 %445 }
  0x70   :  { %v448_v59 = vunpack.i.h.bf16 %v446_v31 }
  0x77   :  { %v461_v52 = vpop.permute.xlu2 %460 }
  0x78   :  { %v462_v60 = vunpack.i.l.bf16 %v461_v52  ;;  %v463_v13 = vunpack.i.h.bf16 %v461_v52  ;;  %v475_v52 = vld [vmem:[%s779_s4] ss:$0 sm:$0xff] }
  0x79   :  { %v421_v28 = vpop.permute.xlu0 %420 }
  0x7a   :  { %v431_v29 = vpop.permute.xlu1 %430  ;;  %v422_v30 = vunpack.i.l.bf16 %v421_v28  ;;  %v423_v33 = vunpack.i.h.bf16 %v421_v28 }
  0x7b   :  { %v432_v37 = vunpack.i.l.bf16 %v431_v29  ;;  %v433_v47 = vunpack.i.h.bf16 %v431_v29 }
  0x7c   :  { %v207_v36 = vsel %vm206_vm7, %v531_v0, %v422_v30  ;;  %v208_v44 = vsel %vm206_vm7, %v536_v1, %v423_v33  ;;  %v447_v0 = vunpack.i.l.bf16 %v446_v31  ;;  %v296_v31 = vld [vmem:[%s778_s3 + $0x10] sm:$0xff]  ;;  %v294_v33 = vld [vmem:[%s778_s3] sm:$0xff] }
  0x7d   :  { %327 = vmatpush.msra.mxu1 %v296_v31 }
  0x7f   :  { %v173_v9 = vpop.permute.xlu2 %172 }
  0x81   :  { %v426_v32 = vpop.permute.xlu0 %425 }
  0x82   :  { %v427_v34 = vunpack.i.l.bf16 %v426_v32  ;;  %v436_v35 = vpop.permute.xlu1 %435  ;;  %v428_v38 = vunpack.i.h.bf16 %v426_v32  ;;  %v295_v32 = vld [vmem:[%s778_s3 + $0x8] sm:$0xff] }
  0x83   :  { %v437_v39 = vunpack.i.l.bf16 %v436_v35  ;;  %v438_v49 = vunpack.i.h.bf16 %v436_v35  ;;  %328 = vmatpush.msra.mxu1 %v295_v32 }
  0x84   :  { %v212_v40 = vsel %vm211_vm8, %v207_v36, %v427_v34  ;;  %v213_v46 = vsel %vm211_vm8, %v208_v44, %v428_v38  ;;  %v474_v34 = vld [vmem:[%s777_s2] ss:$0 sm:$0xff] }
  0x85   :  { %v217_v41 = vsel %vm216_vm9, %v212_v40, %v432_v37  ;;  %v218_v51 = vsel %vm216_vm9, %v213_v46, %v433_v47  ;;  %329 = vmatpush.msra.mxu1 %v294_v33  ;;  %v374_v47 = vld [vmem:[%s780_s5 + $0x18] sm:$0xff] }
  0x86   :  { %v222_v45 = vsel %vm221_vm10, %v217_v41, %v437_v39  ;;  %v223_v57 = vsel %vm221_vm10, %v218_v51, %v438_v49  ;;  %392 = vmatpush.msra.mxu3 %v374_v47  ;;  %v372_v49 = vld [vmem:[%s780_s5 + $0x8] sm:$0xff] }
  0x87   :  { %v227_v48 = vsel %vm226_vm11, %v222_v45, %v442_v43  ;;  %v228_v63 = vsel %vm226_vm11, %v223_v57, %v443_v58  ;;  %v175_v24 = vpop.permute.xlu2 %174 }
  0x88   :  { %v232_v1 = vsel %vm231_vm12, %v227_v48, %v447_v0  ;;  %v233_v10 = vsel %vm231_vm12, %v228_v63, %v448_v59  ;;  %v373_v48 = vld [vmem:[%s780_s5 + $0x10] sm:$0xff] }
  0x89   :  { %v451_v50 = vpop.permute.xlu0 %450  ;;  %393 = vmatpush.msra.mxu3 %v373_v48 }
  0x8a   :  { %v452_v53 = vunpack.i.l.bf16 %v451_v50  ;;  %v456_v54 = vpop.permute.xlu1 %455  ;;  %v453_v61 = vunpack.i.h.bf16 %v451_v50 }
  0x8b   :  { %v457_v55 = vunpack.i.l.bf16 %v456_v54  ;;  %v458_v6 = vunpack.i.h.bf16 %v456_v54  ;;  %394 = vmatpush.msra.mxu3 %v372_v49 }
  0x8c   :  { %v237_v56 = vsel %vm236_vm13, %v232_v1, %v452_v53  ;;  %v238_v12 = vsel %vm236_vm13, %v233_v10, %v453_v61  ;;  %v347_v61 = vld [vmem:[%s781_s7] sm:$0x3] }
  0x8d   :  { %277 = vmatmul.f32.vlgmr.msra.gmra.mxu0 %v237_v56  ;;  %v209_v62 = vsel %vm206_vm7, %v541_v2, %v457_v55  ;;  %v210_v14 = vsel %vm206_vm7, %v581_v26, %v458_v6 }
  0x8e   :  { %v214_v7 = vsel %vm211_vm8, %v209_v62, %v462_v60  ;;  %v215_v19 = vsel %vm211_vm8, %v210_v14, %v463_v13  ;;  %v371_v62 = vld [vmem:[%s780_s5] sm:$0xff] }
  0x8f   :  { %395 = vmatpush.msra.mxu3 %v371_v62 }
  0x91   :  { %v466_v3 = vpop.permute.xlu0 %465 }
  0x92   :  { %v467_v4 = vunpack.i.l.bf16 %v466_v3  ;;  %v471_v5 = vpop.permute.xlu1 %470  ;;  %v468_v15 = vunpack.i.h.bf16 %v466_v3  ;;  %v376_v3 = vstv %s782_s6 }
  0x93   :  { %v472_v8 = vunpack.i.l.bf16 %v471_v5  ;;  %v473_v18 = vunpack.i.h.bf16 %v471_v5 }
  0x94   :  { %v219_v11 = vsel %vm216_vm9, %v214_v7, %v467_v4  ;;  %v220_v22 = vsel %vm216_vm9, %v215_v19, %v468_v15 }
  0x95   :  { %280 = vmatmul.f32.gmra.mxu0 %v238_v12  ;;  %v224_v2 = vsel %vm221_vm10, %v219_v11, %v472_v8  ;;  %v225_v25 = vsel %vm221_vm10, %v220_v22, %v473_v18 }
  0x96   :  { %v229_v17 = vsel %vm226_vm11, %v224_v2, %v173_v9  ;;  %v230_v26 = vsel %vm226_vm11, %v225_v25, %v175_v24 }
  0x99   :  { %v186_v16 = vpop.permute.xlu0 %185 }
  0x9a   :  { %v234_v20 = vsel %vm231_vm12, %v229_v17, %v186_v16  ;;  %v199_v21 = vpop.permute.xlu1 %198 }
  0x9b   :  { %v239_v23 = vsel %vm236_vm13, %v234_v20, %v199_v21 }
  0x9d   :  { %283 = vmatmul.f32.gmra.mxu0 %v239_v23 }
  0xa1   :  { %v188_v27 = vpop.permute.xlu0 %187 }
  0xa2   :  { %v235_v28 = vsel %vm231_vm12, %v230_v26, %v188_v27  ;;  %v201_v29 = vpop.permute.xlu1 %200 }
  0xa3   :  { %v240_v30 = vsel %vm236_vm13, %v235_v28, %v201_v29 }
  0xa5   :  { %286 = vmatmul.f32.gmra.mxu0 %v240_v30 }
 0x10a   :  { %v278_v35 = vpop.f32.mrf.mxu0 }
 0x10b   :  { %v279_v36 = vadd.f32 %v474_v34, %v278_v35 }
 0x10d   :  { %v290_v37 = vmax.f32 %v279_v36, 0.0 }
 0x10f   :  { %406 = vmatmul.msk.f32.vlgmr.msra.gmra.mxu1 %vm211_vm8, %v290_v37 }
 0x112   :  { %v281_v38 = vpop.f32.mrf.mxu0 }
 0x113   :  { %v282_v39 = vadd.f32 %v474_v34, %v281_v38 }
 0x115   :  { %v291_v40 = vmax.f32 %v282_v39, 0.0 }
 0x117   :  { %407 = vmatmul.msk.f32.gmra.mxu1 %vm211_vm8, %v291_v40 }
 0x11a   :  { %v284_v41 = vpop.f32.mrf.mxu0 }
 0x11b   :  { %v285_v42 = vadd.f32 %v474_v34, %v284_v41 }
 0x11d   :  { %v292_v43 = vmax.f32 %v285_v42, 0.0 }
 0x11f   :  { %408 = vmatmul.msk.f32.gmra.mxu1 %vm211_vm8, %v292_v43 }
 0x122   :  { %v287_v44 = vpop.f32.mrf.mxu0 }
 0x123   :  { %v288_v45 = vadd.f32 %v474_v34, %v287_v44 }
 0x125   :  { %v293_v0 = vmax.f32 %v288_v45, 0.0 }
 0x127   :  { %409 = vmatmul.msk.f32.gmra.mxu1 %vm211_vm8, %v293_v0 }
 0x18c   :  { %v331_v46 = vpop.f32.mrf.mxu1 }
 0x18d   :  { %v332_v57 = vadd.f32 %v475_v52, %v331_v46 }
 0x18f   :  { %v343_v60 = vmax.f32 %v332_v57, 0.0 }
 0x194   :  { %v334_v50 = vpop.f32.mrf.mxu1 }
 0x195   :  { %v335_v55 = vadd.f32 %v475_v52, %v334_v50 }
 0x197   :  { %v344_v59 = vmax.f32 %v335_v55, 0.0 }
 0x19c   :  { %v337_v51 = vpop.f32.mrf.mxu1 }
 0x19d   :  { %v338_v54 = vadd.f32 %v475_v52, %v337_v51 }
 0x19f   :  { %v345_v58 = vmax.f32 %v338_v54, 0.0 }
 0x1a4   :  { %v340_v53 = vpop.f32.mrf.mxu1 }
 0x1a5   :  { %v341_v1 = vadd.f32 %v475_v52, %v340_v53 }
 0x1a7   :  { %v346_v56 = vmax.f32 %v341_v1, 0.0 }
 0x1a9   :  { %363 = vmatpush.msra.mxu2 %v346_v56 }
 0x1ab   :  { %364 = vmatpush.msra.mxu2 %v345_v58 }
 0x1ad   :  { %365 = vmatpush.msra.mxu2 %v344_v59 }
 0x1af   :  { %366 = vmatpush.msra.mxu2 %v343_v60 }
 0x1b0   :  { %410 = vmatmul.msk.f32.vlgmr.msra.gmra.mxu2 %vm211_vm8, %v347_v61 }
 0x233   :  { %v368_v63 = vpop.f32.mrf.mxu2 }
 0x234   :  { %411 = vmatmul.msk.f32.vlgmr.msra.gmra.mxu3 %vm211_vm8, %v368_v63 }
 0x2b7   :  { %v397_v4 = vpop.f32.mrf.mxu3 }
 0x2b8   :  { %v398_v5 = vadd.f32 %v397_v4, %v376_v3 }
 0x2ba   :  { %401 = vst.msk [vmem:[%s783_s8] sm:$0x3] %vm400_vm14, %v398_v5 }

</bundles_post_ra>
